<compile_context>
chip_gen: v6e
topology: v6e:2x2x1
jax: 0.10.0
libtpu: 0.0.40
codegen_flags: <defaults>
</compile_context>

<pallas_src>
import functools
from typing import NamedTuple

import jax
import jax.numpy as jnp
from jax.experimental import pallas as pl
from jax.experimental.pallas import tpu as pltpu


def _round_up(n, m):
    return (n + m - 1) // m * m


def _fused_mlp_kernel(x_ref, w0_ref, wh_ref, bh_ref, wv_ref, bv_ref, o_ref, *,
                      num_hidden, in_dim, vpu_layer0):
    # x_ref : (tile_b, in_dim)      un-padded activation tile
    # w0_ref: (in_dim, Dh)          layer-0 weight (hidden dim zero-padded)
    # wh_ref: (max(L-1,1), Dh, Dh)  hidden-layer weights 1..L-1 (VMEM-resident)
    # bh_ref: (L, 1, Dh)            all hidden-layer biases
    # wv_ref: (1, Dh)               value-head weight row
    # bv_ref: (1, 1) SMEM           value-head bias scalar
    # o_ref : (1, tile_b)           one value per row, lane-dense (batch on lanes)
    x = x_ref[...]

    if vpu_layer0:
        # Tiny contraction dim (e.g. a gym state of 4 floats): a static unroll of
        # VPU broadcast-multiply-adds is cheaper than feeding a K<8 matmul to the
        # MXU and lets x stay completely un-padded in the feature dim.
        h = bh_ref[0] + x[:, 0:1] * w0_ref[0:1, :]
        for k in range(1, in_dim):
            h = h + x[:, k:k + 1] * w0_ref[k:k + 1, :]
    else:
        # Large observation vectors: MXU dot with K = in_dim (decoupled from the
        # hidden width Dh), default precision -> single bf16 pass, f32 accumulate.
        h = jnp.dot(x, w0_ref[...], preferred_element_type=jnp.float32) + bh_ref[0]
    h = jnp.maximum(h, 0.0)

    # Hidden layers 1..L-1: Linear + ReLU, activations stay in vregs/VMEM.
    for l in range(num_hidden - 1):
        h = jnp.dot(h, wh_ref[l], preferred_element_type=jnp.float32)
        h = jnp.maximum(h + bh_ref[l + 1], 0.0)

    # Value head (d_out = 1): VPU multiply + XLU lane reduction (kept in f32 for
    # v5e parity); zero-padded lanes of wv contribute exactly 0.  The (tile_b,)
    # result is relaid out to the lane-dense (1, tile_b) block for the store.
    v = jnp.sum(h * wv_ref[...], axis=-1) + bv_ref[0, 0]
    o_ref[...] = v[None, :].astype(o_ref.dtype)


class PackedValueParams(NamedTuple):
    w0: jax.Array        # (in_dim, Dh)
    w_hidden: jax.Array  # (max(L-1,1), Dh, Dh)   dummy zeros slab if L == 1
    b_hidden: jax.Array  # (L, 1, Dh)
    w_head: jax.Array    # (1, Dh)
    b_head: jax.Array    # (1, 1)


def pack_value_estimator_params(params):
    """Pack per-layer (W, b) into padded slabs ONCE (call at init, not per step).

    params: list of (W: (d_in, d_out), b: (1, d_out)); last layer has d_out == 1.
    """
    # TODO(synk): hiddenLayers == [] (a single Linear(in_dim, 1)) is not handled
    # by the fused kernel; the reference module always uses >=1 hidden layer.
    assert len(params) >= 2, "expect at least one hidden layer + value head"
    hidden = params[:-1]
    w_last, b_last = params[-1]
    assert w_last.shape[1] == 1, "value head must have out_dim == 1"

    in_dim = hidden[0][0].shape[0]
    # Hidden widths padded to a lane multiple; layer-0's contraction dim (in_dim)
    # is deliberately NOT folded into this padding.
    d_pad = _round_up(max(w.shape[1] for w, _ in hidden), 128)

    w0 = jnp.zeros((in_dim, d_pad), jnp.float32)
    w0 = w0.at[:, : hidden[0][0].shape[1]].set(hidden[0][0].astype(jnp.float32))

    n_rest = max(len(hidden) - 1, 1)
    w_hidden = jnp.zeros((n_rest, d_pad, d_pad), jnp.float32)
    b_hidden = jnp.zeros((len(hidden), 1, d_pad), jnp.float32)
    b_hidden = b_hidden.at[0, :, : hidden[0][1].shape[1]].set(hidden[0][1])
    for l, (w, b) in enumerate(hidden[1:]):
        w_hidden = w_hidden.at[l, : w.shape[0], : w.shape[1]].set(w)
        b_hidden = b_hidden.at[l + 1, :, : b.shape[1]].set(b)

    w_head = jnp.zeros((1, d_pad), jnp.float32).at[0, : w_last.shape[0]].set(w_last[:, 0])
    b_head = jnp.asarray(b_last, jnp.float32).reshape(1, 1)
    return PackedValueParams(w0, w_hidden, b_hidden, w_head, b_head)


def _batch_tiling(B, block_rows):
    """Pick (tile_b, padded_B).  Adaptive by default: big tiles amortize the
    ~0.35us/grid-step overhead; even tile counts keep both v7x TCs busy."""
    b8 = _round_up(B, 8)
    if block_rows is None:
        if b8 <= 1024:
            return b8, b8                       # single tile
        block_rows = 1024
    assert block_rows % 128 == 0, "multi-tile block_rows must be a multiple of 128"
    if b8 <= block_rows:
        return b8, b8
    return block_rows, _round_up(B, 2 * block_rows)   # even number of tiles


@functools.partial(jax.jit, static_argnames=("block_rows",))
def value_estimator_forward(packed: PackedValueParams, x, *, block_rows=None):
    """Fused MLP forward. x: (B, in_dim) -> (B, 1) float32."""
    in_dim, d_pad = packed.w0.shape
    num_hidden = packed.b_hidden.shape[0]
    B, x_in = x.shape
    assert x_in == in_dim, (x_in, in_dim)

    tile_b, b_pad = _batch_tiling(B, block_rows)
    num_tiles = b_pad // tile_b

    x_f32 = x.astype(jnp.float32)
    if b_pad != B:  # batch-only padding (feature dim is NOT padded)
        x_f32 = jnp.pad(x_f32, ((0, b_pad - B), (0, 0)))

    kernel = functools.partial(
        _fused_mlp_kernel,
        num_hidden=num_hidden,
        in_dim=in_dim,
        vpu_layer0=(in_dim <= 16),
    )

    out = pl.pallas_call(
        kernel,
        out_shape=jax.ShapeDtypeStruct((1, b_pad), jnp.float32),
        grid_spec=pltpu.PrefetchScalarGridSpec(
            num_scalar_prefetch=0,
            grid=(num_tiles,),
            in_specs=[
                # x tile: pipelined over the batch grid, un-padded minor dim.
                pl.BlockSpec((tile_b, in_dim), lambda i: (i, 0)),
                # Parameters: constant index_maps -> VMEM-resident across tiles.
                pl.BlockSpec((in_dim, d_pad), lambda i: (0, 0)),
                pl.BlockSpec(packed.w_hidden.shape, lambda i: (0, 0, 0)),
                pl.BlockSpec((num_hidden, 1, d_pad), lambda i: (0, 0, 0)),
                pl.BlockSpec((1, d_pad), lambda i: (0, 0)),
                pl.BlockSpec(memory_space=pltpu.MemorySpace.SMEM),  # head bias
            ],
            # Lane-dense values: batch mapped to the lane axis.
            out_specs=pl.BlockSpec((1, tile_b), lambda i: (0, i)),
        ),
        compiler_params=pltpu.CompilerParams(
            dimension_semantics=("parallel",),  # 2 TCs on v7x; harmless elsewhere
        ),
    )(x_f32, packed.w0, packed.w_hidden, packed.b_hidden, packed.w_head,
      packed.b_head)

    return out[0, :B].reshape(B, 1)


def init_value_estimator_params(key, in_dim, hidden_layers):
    """Deterministic params matching the ValueEstimator architecture.

    Mimics torch.nn.Linear default init: U(-1/sqrt(fan_in), 1/sqrt(fan_in)).
    Returns a list of (W, b) with W: (d_in, d_out), b: (1, d_out).
    """
    dims = [in_dim] + list(hidden_layers) + [1]
    params = []
    for d_in, d_out in zip(dims[:-1], dims[1:]):
        key, kw, kb = jax.random.split(key, 3)
        bound = 1.0 / jnp.sqrt(jnp.float32(d_in))
        w = jax.random.uniform(kw, (d_in, d_out), jnp.float32, -bound, bound)
        b = jax.random.uniform(kb, (1, d_out), jnp.float32, -bound, bound)
        params.append((w, b))
    return params


def value_estimator_forward_ref(params, x):
    """Pure-JAX f32 reference (ReLU after every layer except the last)."""
    n = len(params)
    h = x.astype(jnp.float32)
    for i, (w, b) in enumerate(params):
        h = jnp.dot(h, w, precision=jax.lax.Precision.HIGHEST) + b
        if i < n - 1:
            h = jnp.maximum(h, 0.0)
    return h


if __name__ == "__main__":
    key = jax.random.PRNGKey(0)
    k_params, k_x, k_x2, k_params3, k_x3 = jax.random.split(key, 5)

    # Kernel matmuls now run at DEFAULT precision (single MXU pass, bf16
    # operands, f32 accumulate) -> compare against the f32 HIGHEST reference
    # with ~1e-2 tolerance.
    TOL = dict(atol=1e-2, rtol=1e-2)

    # --- A: small gym-style state, VPU layer-0 path, single batch tile. ---
    in_dim, hidden_layers, batch = 4, [32, 32], 8
    params = init_value_estimator_params(k_params, in_dim, hidden_layers)
    packed = pack_value_estimator_params(params)   # pack ONCE at init

    x = jax.random.normal(k_x, (batch, in_dim), jnp.float32)
    out = jax.block_until_ready(value_estimator_forward(packed, x))
    ref = value_estimator_forward_ref(params, x)
    assert out.shape == (batch, 1), out.shape
    assert jnp.allclose(out, ref, **TOL), (out, ref)

    # --- B: multi-tile (gridded, batch-padded) path with explicit block_rows. ---
    batch2 = 300
    x2 = jax.random.normal(k_x2, (batch2, in_dim), jnp.float32)
    out2 = jax.block_until_ready(value_estimator_forward(packed, x2, block_rows=256))
    ref2 = value_estimator_forward_ref(params, x2)
    assert out2.shape == (batch2, 1), out2.shape
    assert jnp.allclose(out2, ref2, **TOL)

    # --- C: wide observation vector -> MXU layer-0 path, single hidden layer. ---
    in_dim3, hidden3, batch3 = 256, [48], 64
    params3 = init_value_estimator_params(k_params3, in_dim3, hidden3)
    packed3 = pack_value_estimator_params(params3)
    x3 = jax.random.normal(k_x3, (batch3, in_dim3), jnp.float32)
    out3 = jax.block_until_ready(value_estimator_forward(packed3, x3))
    ref3 = value_estimator_forward_ref(params3, x3)
    assert out3.shape == (batch3, 1), out3.shape
    assert jnp.allclose(out3, ref3, **TOL)

    print("KERNEL_OK")
</pallas_src>

<mosaic_0001>
module attributes {stable_mosaic.version = 11 : i64} {
  func.func @_fused_mlp_kernel(%arg0: i32, %arg1: memref<8x4xf32, #tpu.memory_space<vmem>>, %arg2: memref<4x128xf32, #tpu.memory_space<vmem>>, %arg3: memref<1x128x128xf32, #tpu.memory_space<vmem>>, %arg4: memref<2x1x128xf32, #tpu.memory_space<vmem>>, %arg5: memref<1x128xf32, #tpu.memory_space<vmem>>, %arg6: memref<1x1xf32, #tpu.memory_space<smem>>, %arg7: memref<1x8xf32, #tpu.memory_space<vmem>>) attributes {dimension_semantics = [#tpu.dimension_semantics<parallel>], iteration_bounds = array<i64: 1>, scalar_prefetch = 0 : i64, scratch_operands = 0 : i64, tpu.core_type = #tpu.core_type<tc>, window_params = [{transform_indices = @transform_0, window_bounds = array<i64: 8, 4>}, {pipeline_mode = #tpu.pipeline_mode<synchronous>, transform_indices = @transform_1, window_bounds = array<i64: 4, 128>}, {pipeline_mode = #tpu.pipeline_mode<synchronous>, transform_indices = @transform_2, window_bounds = array<i64: 1, 128, 128>}, {pipeline_mode = #tpu.pipeline_mode<synchronous>, transform_indices = @transform_3, window_bounds = array<i64: 2, 1, 128>}, {pipeline_mode = #tpu.pipeline_mode<synchronous>, transform_indices = @transform_4, window_bounds = array<i64: 1, 128>}, {transform_indices = @transform_5, window_bounds = array<i64: 1, 1>}, {transform_indices = @transform_6, window_bounds = array<i64: 1, 8>}]} {
    %c0 = arith.constant 0 : index
    %c0_0 = arith.constant 0 : index
    %0 = vector.load %arg1[%c0, %c0_0] : memref<8x4xf32, #tpu.memory_space<vmem>>, vector<8x4xf32>
    %c0_1 = arith.constant 0 : index
    %c0_2 = arith.constant 0 : index
    %c0_3 = arith.constant 0 : index
    %1 = vector.load %arg4[%c0_1, %c0_2, %c0_3] : memref<2x1x128xf32, #tpu.memory_space<vmem>>, vector<1x1x128xf32>
    %2 = vector.shape_cast %1 : vector<1x1x128xf32> to vector<1x128xf32>
    %3 = vector.extract_strided_slice %0 {offsets = [0, 0], sizes = [8, 1], strides = [1, 1]} : vector<8x4xf32> to vector<8x1xf32>
    %c0_4 = arith.constant 0 : index
    %c0_5 = arith.constant 0 : index
    %4 = vector.load %arg2[%c0_4, %c0_5] : memref<4x128xf32, #tpu.memory_space<vmem>>, vector<1x128xf32>
    %5 = vector.broadcast %3 : vector<8x1xf32> to vector<8x128xf32>
    %6 = vector.broadcast %4 : vector<1x128xf32> to vector<8x128xf32>
    %7 = arith.mulf %5, %6 : vector<8x128xf32>
    %8 = vector.broadcast %2 : vector<1x128xf32> to vector<8x128xf32>
    %9 = arith.addf %8, %7 : vector<8x128xf32>
    %10 = vector.extract_strided_slice %0 {offsets = [0, 1], sizes = [8, 1], strides = [1, 1]} : vector<8x4xf32> to vector<8x1xf32>
    %c1 = arith.constant 1 : index
    %c0_6 = arith.constant 0 : index
    %11 = vector.load %arg2[%c1, %c0_6] : memref<4x128xf32, #tpu.memory_space<vmem>>, vector<1x128xf32>
    %12 = vector.broadcast %10 : vector<8x1xf32> to vector<8x128xf32>
    %13 = vector.broadcast %11 : vector<1x128xf32> to vector<8x128xf32>
    %14 = arith.mulf %12, %13 : vector<8x128xf32>
    %15 = arith.addf %9, %14 : vector<8x128xf32>
    %16 = vector.extract_strided_slice %0 {offsets = [0, 2], sizes = [8, 1], strides = [1, 1]} : vector<8x4xf32> to vector<8x1xf32>
    %c2 = arith.constant 2 : index
    %c0_7 = arith.constant 0 : index
    %17 = vector.load %arg2[%c2, %c0_7] : memref<4x128xf32, #tpu.memory_space<vmem>>, vector<1x128xf32>
    %18 = vector.broadcast %16 : vector<8x1xf32> to vector<8x128xf32>
    %19 = vector.broadcast %17 : vector<1x128xf32> to vector<8x128xf32>
    %20 = arith.mulf %18, %19 : vector<8x128xf32>
    %21 = arith.addf %15, %20 : vector<8x128xf32>
    %22 = vector.extract_strided_slice %0 {offsets = [0, 3], sizes = [8, 1], strides = [1, 1]} : vector<8x4xf32> to vector<8x1xf32>
    %c3 = arith.constant 3 : index
    %c0_8 = arith.constant 0 : index
    %23 = vector.load %arg2[%c3, %c0_8] : memref<4x128xf32, #tpu.memory_space<vmem>>, vector<1x128xf32>
    %24 = vector.broadcast %22 : vector<8x1xf32> to vector<8x128xf32>
    %25 = vector.broadcast %23 : vector<1x128xf32> to vector<8x128xf32>
    %26 = arith.mulf %24, %25 : vector<8x128xf32>
    %27 = arith.addf %21, %26 : vector<8x128xf32>
    %cst = arith.constant 0.000000e+00 : f32
    %28 = vector.broadcast %cst : f32 to vector<8x128xf32>
    %29 = arith.maximumf %27, %28 : vector<8x128xf32>
    %c0_9 = arith.constant 0 : index
    %c0_10 = arith.constant 0 : index
    %c0_11 = arith.constant 0 : index
    %30 = vector.load %arg3[%c0_9, %c0_10, %c0_11] : memref<1x128x128xf32, #tpu.memory_space<vmem>>, vector<1x128x128xf32>
    %31 = vector.shape_cast %30 : vector<1x128x128xf32> to vector<128x128xf32>
    %cst_12 = arith.constant dense<0.000000e+00> : vector<8x128xf32>
    %32 = tpu.matmul %29, %31, %cst_12 {dimension_numbers = #tpu.dot_dimension_numbers<[1], [0], [0], [1], [0, 0, 1, 1], [], []>} : vector<8x128xf32>, vector<128x128xf32>, vector<8x128xf32> -> vector<8x128xf32>
    %c1_13 = arith.constant 1 : index
    %c0_14 = arith.constant 0 : index
    %c0_15 = arith.constant 0 : index
    %33 = vector.load %arg4[%c1_13, %c0_14, %c0_15] : memref<2x1x128xf32, #tpu.memory_space<vmem>>, vector<1x1x128xf32>
    %34 = vector.shape_cast %33 : vector<1x1x128xf32> to vector<1x128xf32>
    %35 = vector.broadcast %34 : vector<1x128xf32> to vector<8x128xf32>
    %36 = arith.addf %32, %35 : vector<8x128xf32>
    %cst_16 = arith.constant 0.000000e+00 : f32
    %37 = vector.broadcast %cst_16 : f32 to vector<8x128xf32>
    %38 = arith.maximumf %36, %37 : vector<8x128xf32>
    %c0_17 = arith.constant 0 : index
    %c0_18 = arith.constant 0 : index
    %39 = vector.load %arg5[%c0_17, %c0_18] : memref<1x128xf32, #tpu.memory_space<vmem>>, vector<1x128xf32>
    %40 = vector.broadcast %39 : vector<1x128xf32> to vector<8x128xf32>
    %41 = arith.mulf %38, %40 : vector<8x128xf32>
    %cst_19 = arith.constant dense<0.000000e+00> : vector<8xf32>
    %42 = vector.multi_reduction <add>, %41, %cst_19 [1] : vector<8x128xf32> to vector<8xf32>
    %c0_20 = arith.constant 0 : index
    %c0_21 = arith.constant 0 : index
    %43 = memref.load %arg6[%c0_20, %c0_21] : memref<1x1xf32, #tpu.memory_space<smem>>
    %44 = vector.broadcast %43 : f32 to vector<8xf32>
    %45 = arith.addf %42, %44 : vector<8xf32>
    %46 = vector.shape_cast %45 : vector<8xf32> to vector<1x8xf32>
    %c0_22 = arith.constant 0 : index
    %c0_23 = arith.constant 0 : index
    %47 = vector.load %arg7[%c0_22, %c0_23] : memref<1x8xf32, #tpu.memory_space<vmem>>, vector<1x8xf32>
    tpu.vector_store %arg7[%c0_22, %c0_23], %46 {strides = array<i32>} : memref<1x8xf32, #tpu.memory_space<vmem>>, vector<1x8xf32>,
    return
  }
  func.func @transform_0(%arg0: i32) -> (i32, i32) {
    %c0_i32 = arith.constant 0 : i32
    %c0_i32_0 = arith.constant 0 : i32
    return %arg0, %c0_i32 : i32, i32
  }
  func.func @transform_1(%arg0: i32) -> (i32, i32) {
    %c0_i32 = arith.constant 0 : i32
    %c0_i32_0 = arith.constant 0 : i32
    %c0_i32_1 = arith.constant 0 : i32
    return %c0_i32, %c0_i32_0 : i32, i32
  }
  func.func @transform_2(%arg0: i32) -> (i32, i32, i32) {
    %c0_i32 = arith.constant 0 : i32
    %c0_i32_0 = arith.constant 0 : i32
    %c0_i32_1 = arith.constant 0 : i32
    %c0_i32_2 = arith.constant 0 : i32
    return %c0_i32, %c0_i32_0, %c0_i32_1 : i32, i32, i32
  }
  func.func @transform_3(%arg0: i32) -> (i32, i32, i32) {
    %c0_i32 = arith.constant 0 : i32
    %c0_i32_0 = arith.constant 0 : i32
    %c0_i32_1 = arith.constant 0 : i32
    %c0_i32_2 = arith.constant 0 : i32
    return %c0_i32, %c0_i32_0, %c0_i32_1 : i32, i32, i32
  }
  func.func @transform_4(%arg0: i32) -> (i32, i32) {
    %c0_i32 = arith.constant 0 : i32
    %c0_i32_0 = arith.constant 0 : i32
    %c0_i32_1 = arith.constant 0 : i32
    return %c0_i32, %c0_i32_0 : i32, i32
  }
  func.func @transform_5(%arg0: i32) -> (i32, i32) {
    %c0_i32 = arith.constant 0 : i32
    %c0_i32_0 = arith.constant 0 : i32
    %c0_i32_1 = arith.constant 0 : i32
    return %c0_i32, %c0_i32_0 : i32, i32
  }
  func.func @transform_6(%arg0: i32) -> (i32, i32) {
    %c0_i32 = arith.constant 0 : i32
    %c0_i32_0 = arith.constant 0 : i32
    return %c0_i32, %arg0 : i32, i32
  }
}

</mosaic_0001>

<bundles_post_ra>
// kernel: value_estimator_forward.1
= control target key start
LH: loop header
LB: loop body
LE: loop exit
PB: predicated region body
PF: predicated region fallthrough
CT: control target
= control target key end

     0   :  { %12 = vsyncpa [#allocation4], 0  ;;  %s423_s0 = inlined_call_operand.vmem [shape: f32[8,4], index: 0, kind: input, shape index: {}]   ;;  %s424_s1 = inlined_call_operand.vmem [shape: f32[4,128], index: 1, kind: input, shape index: {}]   ;;  %s425_s2 = inlined_call_operand.hbm [shape: f32[1,128,128], index: 2, kind: input, shape index: {}]   ;;  %s426_s3 = inlined_call_operand.vmem [shape: f32[2,1,128], index: 3, kind: input, shape index: {}]   ;;  %s427_s4 = inlined_call_operand.vmem [shape: f32[1,128], index: 4, kind: input, shape index: {}]   ;;  %s428_s5 = inlined_call_operand.<no memory space> [shape: f32[1,1], index: 5, kind: input, shape index: {}]   ;;  %s429_s6 = inlined_call_operand.hbm [shape: f32[1,8], index: 6, kind: output, shape index: {}]  }
   0x1   :  { %13 = vsyncpa [#allocation5], 0  ;;  %s345_s21 = smov [#allocation3]  }
   0x2   :  { %s23_s22 = sshll.u32 %s345_s21, 4  ;;  %s24_s22 = int_to_ptr.vmem [resolvable:$true] %s23_s22 }
   0x3   :  { %s309_s23 = scalar_lea.vmem %s24_s22, 2048  ;;  %p314_p1 = scmp.lt.s32.totalorder %s24_s22, %s24_s22 }
   0x4   :  { %p310_p0 = scmp.ne.s32.totalorder %s24_s22, %s309_s23  ;;  %p315_p2 = scmp.lt.s32.totalorder %s309_s23, %s309_s23 }
   0x6   :  { %p316_p3 = por %p315_p2, %p314_p1 }
   0x8   :  { %p317_p4 = pnand %p316_p3, %p310_p0 }
   0xa   :  { %320 = shalt.err (!%p317_p4)
}
   0xb   :  { %s346_s24 = smov 128   ;;  %s347_s25 = smov 8  }
   0xc   :  { %29 = dma.hbm_to_vmem [thread:$0]  %s425_s2, 2048, %s24_s22, [#allocation4], %s346_s24, %s346_s24, %s347_s25  }
   0xd   :  { %341 = dma.done.wait [#allocation4], 2048  }
   0xe   :  { %342 = vsyncadd [#allocation4], 4294965248  ;;  %v348_v0 = vmov 0   ;;  %v349_v1 = vmov 2   ;;  %v350_v2 = vmov 0.0   ;;  %v39_v3 = vld [vmem:[%s423_s0] sm:$0xff]  ;;  %v202_v47 = vlaneseq }
   0xf   :  { %296 = vset.pattern.permute.xlu0 %v348_v0  ;;  %298 = vset.pattern.permute.xlu1 %v349_v1  ;;  %v108_v4 = vld [vmem:[#allocation3 + $0x78] sm:$0xff]  ;;  %v107_v5 = vld [vmem:[#allocation3 + $0x70] sm:$0xff]  ;;  %v351_v6 = vmov 1   ;;  %v352_v7 = vmov 3   ;;  %v106_v8 = vld [vmem:[#allocation3 + $0x68] sm:$0xff]  ;;  %vm353_vm0 = vmmov 0   ;;  %v199_v50 = vstv %s428_s5 }
  0x10   :  { %251 = vmatprep.subr.mxu0 %v350_v2  ;;  %44 = vperm.xlu0 %296, %v39_v3   ;;  %v105_v9 = vld [vmem:[#allocation3 + $0x60] sm:$0xff]  ;;  %v104_v10 = vld [vmem:[#allocation3 + $0x58] sm:$0xff]  ;;  %v103_v11 = vld [vmem:[#allocation3 + $0x50] sm:$0xff]  ;;  %v203_v48 = vand.u32 127, %v202_v47  ;;  %v205_v49 = vshrl.u32 %v202_v47, 7  ;;  %vm209_vm1 = vcmask 57344  }
  0x11   :  { %72 = vperm.xlu1 %298, %v39_v3   ;;  %252 = vmatpush3.msra.mxu0 %v108_v4  ;;  %v102_v12 = vld [vmem:[#allocation3 + $0x48] sm:$0xff]  ;;  %v101_v13 = vld [vmem:[#allocation3 + $0x40] sm:$0xff]  ;;  %v100_v14 = vld [vmem:[#allocation3 + $0x38] sm:$0xff] }
  0x12   :  { %253 = vmatprep.subr.mxu0 %v350_v2  ;;  %283 = vmatprep.mubr.msk.f32.mxu0 %vm353_vm0, %v350_v2  ;;  %v99_v15 = vld [vmem:[#allocation3 + $0x30] sm:$0xff]  ;;  %v98_v16 = vld [vmem:[#allocation3 + $0x28] sm:$0xff]  ;;  %v97_v17 = vld [vmem:[#allocation3 + $0x20] sm:$0xff]  ;;  %v206_v51 = vsub.s32 %v203_v48, %v205_v49 }
  0x13   :  { %254 = vmatpush3.msra.mxu0 %v107_v5  ;;  %v96_v18 = vld [vmem:[#allocation3 + $0x18] sm:$0xff]  ;;  %v95_v19 = vld [vmem:[#allocation3 + $0x10] sm:$0xff]  ;;  %v94_v20 = vld [vmem:[#allocation3 + $0x8] sm:$0xff] }
  0x14   :  { %297 = vset.pattern.permute.xlu0 %v351_v6  ;;  %255 = vmatprep.subr.mxu0 %v350_v2  ;;  %v93_v21 = vld [vmem:[#allocation3] sm:$0xff] }
  0x15   :  { %299 = vset.pattern.permute.xlu1 %v352_v7  ;;  %61 = vperm.xlu0 %297, %v39_v3   ;;  %v226_v22 = vld [vmem:[%s424_s1] ss:$0 sm:$0xff]  ;;  %v228_v27 = vld [vmem:[%s424_s1 + $0x1] ss:$0 sm:$0xff]  ;;  %v229_v28 = vld [vmem:[%s424_s1 + $0x2] ss:$0 sm:$0xff] }
  0x16   :  { %83 = vperm.xlu1 %299, %v39_v3   ;;  %256 = vmatpush3.msra.mxu0 %v106_v8  ;;  %v227_v26 = vld [vmem:[%s426_s3] ss:$0 sm:$0xff]  ;;  %v230_v30 = vld [vmem:[%s424_s1 + $0x3] ss:$0 sm:$0xff]  ;;  %v232_v40 = vld [vmem:[%s426_s3 + $0x1] ss:$0 sm:$0xff] }
  0x17   :  { %257 = vmatprep.subr.mxu0 %v350_v2  ;;  %v233_v44 = vld [vmem:[%s427_s4] ss:$0 sm:$0xff]  ;;  %s354_s3 = smov [#allocation6]  }
  0x18   :  { %258 = vmatpush3.msra.mxu0 %v105_v9  ;;  %s217_s19 = sshll.u32 %s354_s3, 4  ;;  %s218_s19 = int_to_ptr.vmem [resolvable:$true] %s217_s19 }
  0x19   :  { %300 = vset.pattern.permute.xlu0 %v352_v7  ;;  %259 = vmatprep.subr.mxu0 %v350_v2  ;;  %s321_s4 = scalar_lea.vmem %s218_s19, 16  ;;  %s325_s20 = scalar_lea.vmem %s218_s19, 32 }
  0x1a   :  { %260 = vmatpush3.msra.mxu0 %v104_v10  ;;  %p322_p5 = scmp.ne.s32.totalorder %s218_s19, %s321_s4  ;;  %p326_p6 = scmp.lt.s32.totalorder %s218_s19, %s218_s19 }
  0x1b   :  { %261 = vmatprep.subr.mxu0 %v350_v2  ;;  %p327_p7 = scmp.lt.s32.totalorder %s325_s20, %s321_s4 }
  0x1c   :  { %262 = vmatpush3.msra.mxu0 %v103_v11 }
  0x1d   :  { %263 = vmatprep.subr.mxu0 %v350_v2  ;;  %p328_p8 = por %p327_p7, %p326_p6 }
  0x1e   :  { %264 = vmatpush3.msra.mxu0 %v102_v12 }
  0x1f   :  { %265 = vmatprep.subr.mxu0 %v350_v2  ;;  %p329_p9 = pnand %p328_p8, %p322_p5 }
  0x20   :  { %266 = vmatpush3.msra.mxu0 %v101_v13 }
  0x21   :  { %267 = vmatprep.subr.mxu0 %v350_v2 }
  0x22   :  { %268 = vmatpush3.msra.mxu0 %v100_v14 }
  0x23   :  { %269 = vmatprep.subr.mxu0 %v350_v2 }
  0x24   :  { %270 = vmatpush3.msra.mxu0 %v99_v15 }
  0x25   :  { %271 = vmatprep.subr.mxu0 %v350_v2 }
  0x26   :  { %272 = vmatpush3.msra.mxu0 %v98_v16 }
  0x27   :  { %273 = vmatprep.subr.mxu0 %v350_v2 }
  0x28   :  { %274 = vmatpush3.msra.mxu0 %v97_v17 }
  0x29   :  { %275 = vmatprep.subr.mxu0 %v350_v2 }
  0x2a   :  { %276 = vmatpush3.msra.mxu0 %v96_v18 }
  0x2b   :  { %277 = vmatprep.subr.mxu0 %v350_v2 }
  0x2c   :  { %278 = vmatpush3.msra.mxu0 %v95_v19 }
  0x2d   :  { %279 = vmatprep.subr.mxu0 %v350_v2 }
  0x2e   :  { %280 = vmatpush3.msra.mxu0 %v94_v20 }
  0x2f   :  { %281 = vmatprep.subr.mxu0 %v350_v2 }
  0x30   :  { %282 = vmatpush3.msra.mxu0 %v93_v21 }
  0x8b   :  { %v45_v23 = vpop.permute.xlu0 %44 }
  0x8c   :  { %v73_v24 = vpop.permute.xlu1 %72  ;;  %v51_v25 = vmul.f32 %v226_v22, %v45_v23 }
  0x8d   :  { %v79_v34 = vmul.f32 %v229_v28, %v73_v24 }
  0x8e   :  { %v58_v32 = vadd.f32 %v227_v26, %v51_v25 }
  0x90   :  { %v62_v29 = vpop.permute.xlu0 %61 }
  0x91   :  { %v84_v31 = vpop.permute.xlu1 %83  ;;  %v68_v33 = vmul.f32 %v228_v27, %v62_v29 }
  0x92   :  { %v90_v36 = vmul.f32 %v230_v30, %v84_v31 }
  0x93   :  { %v69_v35 = vadd.f32 %v68_v33, %v58_v32 }
  0x95   :  { %v80_v37 = vadd.f32 %v79_v34, %v69_v35 }
  0x97   :  { %v91_v38 = vadd.f32 %v90_v36, %v80_v37 }
  0x99   :  { %v92_v39 = vmax.f32 %v91_v38, 0.0 }
  0x9b   :  { %284 = vmatmul.mubr.f32.vlgmr.msra.gmra.mxu0 %v92_v39 }
 0x15b   :  { %v183_v41 = vpop.f32.mrf.mxu0 }
 0x15c   :  { %v184_v42 = vadd.f32 %v232_v40, %v183_v41 }
 0x15d   :  { %v285_v43 = vpop.f32.mrf.mxu0 }
 0x15e   :  { %v187_v45 = vmax.f32 %v184_v42, 0.0 }
 0x160   :  { %v195_v46 = vmul.f32 %v233_v44, %v187_v45 }
 0x162   :  { %196 = vadd.xlane.f32.xlu1 %v195_v46 }
 0x1eb   :  { %v197_v52 = vpop.xlane.xlu1 %196 }
 0x1ec   :  { %v200_v53 = vadd.f32 %v199_v50, %v197_v52 }
 0x1ee   :  { %v207_v54 = vrot.slane %v200_v53, %v206_v51 }
 0x1f0   :  { %210 = vst.msk [vmem:[#allocation6] sm:$0x1] %vm209_vm1, %v207_v54 }
 0x1f1   :  { %332 = shalt.err (!%p329_p9)
}
 0x1f2   :  { %220 = dma.vmem_to_hbm [thread:$0]  %s218_s19, 16, %s429_s6, [#allocation5]  }
 0x1f3   :  { %343 = dma.done.wait [#allocation5], 16  }
 0x1f4   :  { %344 = vsyncadd [#allocation5], 4294967280 }
 0x1f5   :  { %224 = vsyncpa [#allocation4], 1 }
 0x1f6   :  { %225 = vsyncpa [#allocation5], 1 }

</bundles_post_ra>
